<compile_context>
chip_gen: v6e
topology: v6e:2x2x1
jax: 0.10.0
libtpu: 0.0.40
codegen_flags: <defaults>
</compile_context>

<pallas_src>
import math

import jax
import jax.numpy as jnp
from jax.experimental import pallas as pl
from jax.experimental.pallas import tpu as pltpu


def _attention_kernel(x_ref, w_ref, o_ref):
    # x_ref: (TB, S, F) batch tile; w_ref: (1, F) lane-dense weight;
    # o_ref: (TB, F) output tile (sublane x lane dense).
    x = x_ref[...]                                   # (TB, S, F) f32
    w = w_ref[...]                                   # (1, F)

    # Scores on the VPU/XLU (exact f32): elementwise multiply with the
    # implicitly broadcast weight, then a lane reduce over F. Kept 2-D.
    eij = jnp.tanh(jnp.sum(x * w[None, :, :], axis=-1))         # (TB, S)
    a = jnp.exp(eij)                                             # (TB, S)
    a = a / jnp.sum(a, axis=-1, keepdims=True) + 1e-10           # eps AFTER div

    # Weighted pooling: VPU multiply + sublane reduce over S -> (TB, F).
    out = jnp.sum(x * a[:, :, None], axis=1)                     # (TB, F)
    o_ref[...] = out.astype(o_ref.dtype)


def _vmem_limit_bytes():
    """Scoped-VMEM request: chip capacity minus headroom (capped at 96 MiB)."""
    cap = 64 * 1024 * 1024          # conservative (v7x) fallback
    try:
        cap = int(pltpu.get_tpu_info().vmem_capacity_bytes)
    except Exception:
        pass
    headroom = 16 * 1024 * 1024     # Mosaic internal scratch, misc buffers
    return max(min(cap - headroom, 96 * 1024 * 1024), 32 * 1024 * 1024)


def _choose_batch_tile(batch, step, feat, itemsize,
                       target_block_bytes=8 * 1024 * 1024):
    """Rows of the batch processed per grid step.

    Sized for ~8 MiB input blocks (amortizes per-step pipeline overhead on all
    TPU generations), kept a multiple of 8 rows so output stores stay
    sublane-dense, and shrunk (never below 8 rows) until the grid has an even
    length >= 4 so both v7x TensorCores get >= 2 pipelined steps each.
    """
    per_row = max(step * feat * itemsize, 1)
    tb = min(max(target_block_bytes // per_row, 8), max(batch, 1))
    if tb >= 8:
        tb -= tb % 8
    tb = max(int(tb), 1)
    while tb > 8:
        n = pl.cdiv(batch, tb)
        if n >= 4 and n % 2 == 0:
            break
        tb -= 8
    return max(int(tb), 1)


def attention_forward(x, weight):
    """x: (B, S, F) float32, weight: (F, 1) float32 -> (B, F) float32."""
    B, S, F = x.shape
    assert weight.shape == (F, 1)
    w_row = weight.T                                  # (1, F): lane-dense layout
    itemsize = x.dtype.itemsize
    TB = _choose_batch_tile(B, S, F, itemsize)
    grid = (pl.cdiv(B, TB),)

    cost = pl.CostEstimate(
        flops=4 * B * S * F + 4 * B * S,
        transcendentals=2 * B * S,                    # tanh + exp per (B, S)
        bytes_accessed=(B * S * F + F + B * F) * itemsize,
    )

    return pl.pallas_call(
        _attention_kernel,
        out_shape=jax.ShapeDtypeStruct((B, F), x.dtype),
        grid_spec=pltpu.PrefetchScalarGridSpec(
            num_scalar_prefetch=0,
            grid=grid,
            in_specs=[
                pl.BlockSpec((TB, S, F), lambda b: (b, 0, 0)),
                pl.BlockSpec((1, F), lambda b: (0, 0)),
            ],
            out_specs=pl.BlockSpec((TB, F), lambda b: (b, 0)),
        ),
        compiler_params=pltpu.CompilerParams(
            dimension_semantics=("parallel",),
            vmem_limit_bytes=_vmem_limit_bytes(),
        ),
        cost_estimate=cost,
    )(x, w_row)


def attention_reference(x, weight):
    """Pure-JAX reference mirroring the PyTorch forward exactly (f32)."""
    B, S, F = x.shape
    eij = jnp.matmul(x.reshape(-1, F), weight,
                     precision=jax.lax.Precision.HIGHEST).reshape(B, S)
    eij = jnp.tanh(eij)
    a = jnp.exp(eij)
    a = a / jnp.sum(a, axis=1, keepdims=True) + 1e-10
    return jnp.sum(x * a[..., None], axis=1)


def init_attention_weight(key, feature_dim):
    # torch.nn.init.xavier_uniform_ on a (feature_dim, 1) tensor:
    # fan_in = 1, fan_out = feature_dim, bound = sqrt(6 / (fan_in + fan_out))
    bound = math.sqrt(6.0 / (1 + feature_dim))
    return jax.random.uniform(
        key, (feature_dim, 1), dtype=jnp.float32, minval=-bound, maxval=bound
    )


if __name__ == "__main__":
    key = jax.random.PRNGKey(0)
    kx, kw = jax.random.split(key)

    # Small shapes consistent with the module: F = 2 * encoder_size = 128.
    B, S, F = 16, 8, 128
    x = jax.random.normal(kx, (B, S, F), dtype=jnp.float32)
    weight = init_attention_weight(kw, F)

    out = jax.block_until_ready(attention_forward(x, weight))
    ref = attention_reference(x, weight)
    assert out.shape == (B, F)
    # Kernel math is exact f32 on the VPU; only transcendental-approximation
    # and reduction-order differences vs. the XLA reference remain.
    assert jnp.allclose(out, ref, atol=1e-4, rtol=1e-4), float(
        jnp.max(jnp.abs(out - ref))
    )

    # Ragged last batch tile (B % TB != 0): padded rows compute on unspecified
    # data but are clipped on writeback; per-row math keeps valid rows clean.
    B2 = 13
    x2 = jax.random.normal(jax.random.PRNGKey(1), (B2, S, F), dtype=jnp.float32)
    out2 = jax.block_until_ready(attention_forward(x2, weight))
    ref2 = attention_reference(x2, weight)
    assert out2.shape == (B2, F)
    assert jnp.allclose(out2, ref2, atol=1e-4, rtol=1e-4), float(
        jnp.max(jnp.abs(out2 - ref2))
    )

    print("KERNEL_OK")
</pallas_src>

<mosaic_0001>
module attributes {stable_mosaic.version = 11 : i64} {
  func.func @_attention_kernel(%arg0: i32, %arg1: memref<8x8x128xf32, #tpu.memory_space<vmem>>, %arg2: memref<1x128xf32, #tpu.memory_space<vmem>>, %arg3: memref<8x128xf32, #tpu.memory_space<vmem>>) attributes {dimension_semantics = [#tpu.dimension_semantics<parallel>], iteration_bounds = array<i64: 2>, scalar_prefetch = 0 : i64, scratch_operands = 0 : i64, tpu.core_type = #tpu.core_type<tc>, window_params = [{transform_indices = @transform_0, window_bounds = array<i64: 8, 8, 128>}, {pipeline_mode = #tpu.pipeline_mode<synchronous>, transform_indices = @transform_1, window_bounds = array<i64: 1, 128>}, {transform_indices = @transform_2, window_bounds = array<i64: 8, 128>}]} {
    %c0 = arith.constant 0 : index
    %c0_0 = arith.constant 0 : index
    %c0_1 = arith.constant 0 : index
    %0 = vector.load %arg1[%c0, %c0_0, %c0_1] : memref<8x8x128xf32, #tpu.memory_space<vmem>>, vector<8x8x128xf32>
    %c0_2 = arith.constant 0 : index
    %c0_3 = arith.constant 0 : index
    %1 = vector.load %arg2[%c0_2, %c0_3] : memref<1x128xf32, #tpu.memory_space<vmem>>, vector<1x128xf32>
    %2 = vector.shape_cast %1 : vector<1x128xf32> to vector<1x1x128xf32>
    %3 = vector.broadcast %2 : vector<1x1x128xf32> to vector<8x8x128xf32>
    %4 = arith.mulf %0, %3 : vector<8x8x128xf32>
    %cst = arith.constant dense<0.000000e+00> : vector<8x8xf32>
    %5 = vector.multi_reduction <add>, %4, %cst [2] : vector<8x8x128xf32> to vector<8x8xf32>
    %6 = math.tanh %5 : vector<8x8xf32>
    %7 = math.exp %6 : vector<8x8xf32>
    %cst_4 = arith.constant dense<0.000000e+00> : vector<8xf32>
    %8 = vector.multi_reduction <add>, %7, %cst_4 [1] : vector<8x8xf32> to vector<8xf32>
    %9 = vector.shape_cast %8 : vector<8xf32> to vector<8x1xf32>
    %10 = vector.broadcast %9 : vector<8x1xf32> to vector<8x8xf32>
    %11 = arith.divf %7, %10 : vector<8x8xf32>
    %cst_5 = arith.constant 1.000000e-10 : f32
    %12 = vector.broadcast %cst_5 : f32 to vector<8x8xf32>
    %13 = arith.addf %11, %12 : vector<8x8xf32>
    %14 = vector.shape_cast %13 : vector<8x8xf32> to vector<8x8x1xf32>
    %15 = vector.broadcast %14 : vector<8x8x1xf32> to vector<8x8x128xf32>
    %16 = arith.mulf %0, %15 : vector<8x8x128xf32>
    %cst_6 = arith.constant dense<0.000000e+00> : vector<8x128xf32>
    %17 = vector.multi_reduction <add>, %16, %cst_6 [1] : vector<8x8x128xf32> to vector<8x128xf32>
    %c0_7 = arith.constant 0 : index
    %c0_8 = arith.constant 0 : index
    %18 = vector.load %arg3[%c0_7, %c0_8] : memref<8x128xf32, #tpu.memory_space<vmem>>, vector<8x128xf32>
    tpu.vector_store %arg3[%c0_7, %c0_8], %17 {strides = array<i32>} : memref<8x128xf32, #tpu.memory_space<vmem>>, vector<8x128xf32>,
    return
  }
  func.func @transform_0(%arg0: i32) -> (i32, i32, i32) {
    %c0_i32 = arith.constant 0 : i32
    %c0_i32_0 = arith.constant 0 : i32
    %c0_i32_1 = arith.constant 0 : i32
    return %arg0, %c0_i32, %c0_i32_0 : i32, i32, i32
  }
  func.func @transform_1(%arg0: i32) -> (i32, i32) {
    %c0_i32 = arith.constant 0 : i32
    %c0_i32_0 = arith.constant 0 : i32
    %c0_i32_1 = arith.constant 0 : i32
    return %c0_i32, %c0_i32_0 : i32, i32
  }
  func.func @transform_2(%arg0: i32) -> (i32, i32) {
    %c0_i32 = arith.constant 0 : i32
    %c0_i32_0 = arith.constant 0 : i32
    return %arg0, %c0_i32 : i32, i32
  }
}

</mosaic_0001>

<bundles_post_ra>
// kernel: tpu_custom_call.1
= control target key start
LH: loop header
LB: loop body
LE: loop exit
PB: predicated region body
PF: predicated region fallthrough
CT: control target
= control target key end

     0   :  { %7 = vsyncpa [#allocation3], 0  ;;  %s1008_s0 = inlined_call_operand.hbm [shape: f32[16,8,128], index: 0, kind: input, shape index: {}]   ;;  %s1009_s1 = inlined_call_operand.vmem [shape: f32[1,128], index: 1, kind: input, shape index: {}]   ;;  %s1010_s2 = inlined_call_operand.hbm [shape: f32[16,128], index: 2, kind: output, shape index: {}]  }
   0x1   :  { %9 = vsyncpa [#allocation3 + $0x1], 0 }
   0x2   :  { %10 = vsyncpa [#allocation4], 0 }
   0x3   :  { %12 = vsyncpa [#allocation4 + $0x1], 0  ;;  %s777_s9 = smov 0   ;;  %s779_s10 = smov 0  }
   0x4   :  { %s781_s11 = smov 0   ;;  %s783_s12 = smov 0  }
   0x5 LB: > { %s798_s13 = sadd.s32 4294967295, %s755_s12   ;;  %s549_s14 = sadd.s32 4294967294, %s755_s12   ;;  %s755_s12 = sphi %s783_s12, %s1025_s12   ;;  %s751_s11 = sphi %s781_s11, %s1024_s11   ;;  %s747_s10 = sphi %s779_s10, %s1023_s10   ;;  %s743_s9 = sphi %s777_s9, %s1022_s9  }
   0x6   : > { %s802_s15 = sadd.s32 1, %s755_s12   ;;  %s25_s16 = sadd.s32 1, %s751_s11 }
   0x7   : > { %s22_s17 = ssub.s32 %s755_s12, %s802_s15  ;;  %p32_p0 = scmp.ne.s32.totalorder %s751_s11, %s747_s10 }
   0x8   : > { %p23_p1 = scmp.eq.s32.totalorder %s22_s17, 0  ;;  %p33_p2 = scmp.eq.s32.totalorder %s755_s12, 0 }
   0x9   : > { %p38_p3 = scmp.ne.s32.totalorder %s747_s10, %s743_s9  ;;  %p39_p4 = scmp.eq.s32.totalorder %s798_s13, 0 }
   0xa   : > { %s814_s18 = scalar_select %p23_p1, %s751_s11, %s25_s16  }
   0xb   : > { %p816_p5 = por %p33_p2, %p32_p0  ;;  %p820_p6 = por %p39_p4, %p38_p3 }
   0xc   : > { %p83_p7 = scmp.eq.s32.totalorder %s798_s13, 1  ;;  %p89_p8 = scmp.eq.s32.totalorder %s549_s14, 1 }
   0xd   : > { %s1014_s20 = scalar_select %p820_p6, 1, 0 }
   0xe   : > { %p576_p10 = scmp.lt.s32.totalorder %s755_s12, 2  ;;  %p827_p11 = por %p83_p7, %p32_p0 }
   0xf   : > { %p831_p12 = por %p89_p8, %p38_p3  ;;  %s112_s23 = sand.u32 1, %s751_s11  }
  0x10   : > { %s1015_s21 = scalar_select %p827_p11, 1, 0 }
  0x11   : > { %s1016_s22 = scalar_select %p831_p12, 1, 0 }
  0x12   : > { %s563_s24 = sshll.u32 %s755_s12, 10  ;;  %s552_s25 = sshll.u32 %s112_s23, 6 }
  0x13   : > { %s840_s28 = scalar_lea.hbm %s1008_s0, %s563_s24  ;;  %s116_s29 = scalar_lea.vmem [#allocation2], %s552_s25 }
  0x14   : > { %s123_s30 = sshll.u32 %s116_s29, 4  ;;  %p844_p13 = pnand %p576_p10, %p816_p5  ;;  %s848_s30 = int_to_ptr.vmem [resolvable:$true] %s123_s30 }
  0x15   : > { %s850_s4 = scalar_lea.sflag [#allocation3], %s112_s23  ;;  %s663_s5 = scalar_lea.hbm %s840_s28, 1024 }
  0x16   : > { %p664_p0 = scmp.ne.s32.totalorder %s840_s28, %s663_s5  ;;  %p665_p1 = pneg %p844_p13 }
  0x17   : > { %s668_s8 = scalar_lea.hbm %s1008_s0, 2048  ;;  %p669_p4 = scmp.lt.s32.totalorder %s840_s28, %s1008_s0 }
  0x18   : > { %p666_p2 = pnand %p665_p1, %p664_p0  ;;  %p670_p5 = scmp.lt.s32.totalorder %s668_s8, %s663_s5 }
  0x1a   : > { %p667_p3 = pneg %p666_p2  ;;  %p671_p7 = por %p670_p5, %p669_p4 }
  0x1c   : > { %p672_p8 = pnand %p671_p7, %p667_p3 }
  0x1e   : > { %675 = shalt.err (!%p672_p8)
}
  0x1f   : > { %s676_s17 = scalar_lea.vmem %s848_s30, 1024  ;;  %s757_s19 = smov [#allocation2]  }
  0x20   : > { %p677_p10 = scmp.ne.s32.totalorder %s848_s30, %s676_s17  ;;  %s681_s23 = sshll.u32 %s757_s19, 4  ;;  %s682_s23 = int_to_ptr.vmem [resolvable:$false] %s681_s23 }
  0x21   : > { %s683_s24 = scalar_lea.vmem %s682_s23, 2048  ;;  %p684_p2 = scmp.lt.s32.totalorder %s848_s30, %s682_s23 }
  0x22   : > { %p679_p9 = pnand %p677_p10, %p665_p1  ;;  %p685_p12 = scmp.lt.s32.totalorder %s683_s24, %s676_s17 }
  0x24   : > { %p680_p0 = pneg %p679_p9  ;;  %p686_p11 = por %p685_p12, %p684_p2 }
  0x26   : > { %p687_p6 = pnand %p686_p11, %p680_p0 }
  0x28   : > { %690 = shalt.err (!%p687_p6)
}
  0x29   : > { %s758_s25 = smov 128   ;;  %s759_s26 = smov 8  }
  0x2a   : > { %571 = dma.hbm_to_vmem [thread:$0]  (!%p844_p13), %s840_s28, 1024, %s848_s30, %s850_s4, %s758_s25, %s758_s25, %s759_s26  }
  0x2b   : > { %p555_p9 = scmp.ge.s32.totalorder %s755_s12, 1  ;;  %p131_p1 = scmp.lt.s32.totalorder %s755_s12, 3 }
  0x2d   : > { %p132_p3 = pnand %p555_p9, %p131_p1 }
  0x2e   : > { %s874_s27 = sand.u32 (!%p132_p3), 1, %s747_s10   ;;  %p1018_p6 = scmp.ne.s32.totalorder (!%p132_p3), %s1014_s20, 0 }
  0x2f   : > { %135 = sbr.rel (%p132_p3) target bundleno = 577 (0x241), region = 28  ;;  %s556_s29 = sshll.u32 (!%p132_p3), %s874_s27, 6 }
  0x30   : > { %s138_s5 = scalar_lea.sflag (!%p132_p3), [#allocation3], %s874_s27  ;;  %s141_s6 = scalar_lea.vmem (!%p132_p3), [#allocation2], %s556_s29 }
  0x34   : > { %734 = dma.done.wait (%p1018_p6), %s138_s5, 1024  }
  0x35   : > { %736 = vsyncadd (%p1018_p6), %s138_s5, 4294966272  ;;  %v882_v0 = vld [vmem:[%s141_s6] sm:$0xff]  ;;  %v887_v2 = vld [vmem:[%s141_s6 + $0x10] sm:$0xff]  ;;  %v234_v35 = vlaneseq  ;;  %vm268_vm0 = vcmask 1041409   ;;  %vm270_vm1 = vcmask 1042434   ;;  %vm272_vm2 = vcmask 1043459  }
  0x36   : > { %v558_v1 = vld [vmem:[%s1009_s1] ss:$0 sm:$0xff]  ;;  %v891_v5 = vld [vmem:[%s141_s6 + $0x8] sm:$0xff]  ;;  %v893_v6 = vld [vmem:[%s141_s6 + $0x18] sm:$0xff]  ;;  %vm274_vm3 = vcmask 1044484   ;;  %vm276_vm4 = vcmask 1045509  }
  0x37   : > { %v178_v3 = vmul.f32 %v558_v1, %v882_v0  ;;  %v180_v4 = vmul.f32 %v558_v1, %v887_v2  ;;  %v179_v7 = vmul.f32 %v558_v1, %v891_v5  ;;  %v181_v8 = vmul.f32 %v558_v1, %v893_v6  ;;  %v897_v9 = vld [vmem:[%s141_s6 + $0x20] sm:$0xff]  ;;  %v899_v10 = vld [vmem:[%s141_s6 + $0x28] sm:$0xff]  ;;  %v903_v13 = vld [vmem:[%s141_s6 + $0x30] sm:$0xff]  ;;  %s557_s20 = sshll.u32 %s874_s27, 3  ;;  %s560_s3 = sshll.u32 %s798_s13, 7 }
  0x38   : > { %v182_v11 = vmul.f32 %v558_v1, %v897_v9  ;;  %v183_v12 = vmul.f32 %v558_v1, %v899_v10  ;;  %v905_v14 = vld [vmem:[%s141_s6 + $0x38] sm:$0xff]  ;;  %v184_v15 = vmul.f32 %v558_v1, %v903_v13  ;;  %v235_v40 = vand.u32 127, %v234_v35  ;;  %s161_s4 = scalar_lea.vmem [#allocation5], %s557_s20  ;;  %s970_s16 = scalar_lea.hbm %s1010_s2, %s560_s3 }
  0x39   : > { %186 = vadd.xlane.f32.xlu0 %v178_v3  ;;  %190 = vadd.xlane.f32.xlu1 %v180_v4  ;;  %v185_v16 = vmul.f32 %v558_v1, %v905_v14  ;;  %v909_v41 = vshrl.u32 %v234_v35, 7  ;;  %vm278_vm5 = vcmask 1046534   ;;  %vm280_vm6 = vcmask 1047559   ;;  %s479_s7 = sshll.u32 %s161_s4, 4  ;;  %s466_s17 = scalar_lea.sflag [#allocation4], %s874_s27  ;;  %s480_s7 = int_to_ptr.vmem [resolvable:$true] %s479_s7 }
  0x3a   : > { %vm283_vm7 = vcmask 64512   ;;  %s691_s13 = scalar_lea.vmem %s480_s7, 128  ;;  %p1019_p12 = scmp.ne.s32.totalorder %s1015_s21, 0 }
  0x3b   : > { %v238_v44 = vsub.s32 %v235_v40, %v909_v41  ;;  %p692_p11 = scmp.ne.s32.totalorder %s480_s7, %s691_s13  ;;  %s761_s19 = smov [#allocation5]  }
  0x3c   : > { %s695_s23 = sshll.u32 %s761_s19, 4  ;;  %s696_s23 = int_to_ptr.vmem [resolvable:$false] %s695_s23 }
  0x3d   : > { %188 = vadd.xlane.f32.xlu0 %v179_v7  ;;  %192 = vadd.xlane.f32.xlu1 %v181_v8  ;;  %p693_p13 = pnand %p692_p11, %p1019_p12  ;;  %s697_s24 = scalar_lea.vmem %s696_s23, 256 }
  0x3e   : > { %p698_p5 = scmp.lt.s32.totalorder %s480_s7, %s696_s23  ;;  %p699_p7 = scmp.lt.s32.totalorder %s697_s24, %s691_s13 }
  0x3f   : > { %p694_p4 = pneg %p693_p13 }
  0x40   : > { %p700_p8 = por %p699_p7, %p698_p5 }
  0x41   : > { %194 = vadd.xlane.f32.xlu0 %v182_v11  ;;  %196 = vadd.xlane.f32.xlu1 %v183_v12  ;;  %v760_v11 = vmov 0   ;;  %v294_v12 = vsub.s32 1, %v909_v41 }
  0x42   : > { %614 = vset.pattern.permute.xlu0 %v760_v11  ;;  %613 = vset.pattern.permute.xlu1 %v760_v11  ;;  %p701_p10 = pnand %p700_p8, %p694_p4 }
  0x45   : > { %198 = vadd.xlane.f32.xlu0 %v184_v15  ;;  %200 = vadd.xlane.f32.xlu1 %v185_v16  ;;  %v290_v15 = vsub.s32 0, %v909_v41  ;;  %v298_v16 = vsub.s32 2, %v909_v41 }
  0xc2   : > { %v187_v17 = vpop.xlane.xlu0 %186  ;;  %v191_v18 = vpop.xlane.xlu1 %190 }
  0xc3   : > { %615 = vtanh.f32 %v187_v17 }
  0xc4   : > { %617 = vtanh.f32 %v191_v18  ;;  %v302_v18 = vsub.s32 3, %v909_v41 }
  0xc6   : > { %v189_v19 = vpop.xlane.xlu0 %188  ;;  %v193_v20 = vpop.xlane.xlu1 %192 }
  0xc7   : > { %619 = vtanh.f32 %v189_v19 }
  0xc8   : > { %621 = vtanh.f32 %v193_v20 }
  0xca   : > { %v195_v21 = vpop.xlane.xlu0 %194  ;;  %v197_v22 = vpop.xlane.xlu1 %196 }
  0xcb   : > { %623 = vtanh.f32 %v195_v21 }
  0xcc   : > { %625 = vtanh.f32 %v197_v22 }
  0xce   : > { %v199_v23 = vpop.xlane.xlu0 %198  ;;  %v201_v24 = vpop.xlane.xlu1 %200 }
  0xcf   : > { %627 = vtanh.f32 %v199_v23  ;;  %v306_v23 = vsub.s32 4, %v909_v41 }
  0xd0   : > { %v616_v25 = vpop.eup %615  ;;  %629 = vtanh.f32 %v201_v24 }
  0xd1   : > { %v618_v26 = vpop.eup %617  ;;  %v210_v27 = vmul.f32 1.442695, %v616_v25  ;;  %v310_v25 = vsub.s32 5, %v909_v41 }
  0xd2   : > { %v214_v28 = vmul.f32 1.442695, %v618_v26 }
  0xd3   : > { %631 = vpow2.f32 %v210_v27  ;;  %v314_v27 = vsub.s32 6, %v909_v41 }
  0xd4   : > { %v620_v29 = vpop.eup %619  ;;  %633 = vpow2.f32 %v214_v28 }
  0xd5   : > { %v622_v30 = vpop.eup %621  ;;  %v212_v31 = vmul.f32 1.442695, %v620_v29 }
  0xd6   : > { %v216_v32 = vmul.f32 1.442695, %v622_v30  ;;  %v318_v30 = vsub.s32 7, %v909_v41 }
  0xd7   : > { %635 = vpow2.f32 %v212_v31 }
  0xd8   : > { %v624_v33 = vpop.eup %623  ;;  %637 = vpow2.f32 %v216_v32 }
  0xd9   : > { %v626_v34 = vpop.eup %625  ;;  %v218_v36 = vmul.f32 1.442695, %v624_v33 }
  0xda   : > { %v220_v37 = vmul.f32 1.442695, %v626_v34 }
  0xdb   : > { %639 = vpow2.f32 %v218_v36 }
  0xdc   : > { %v628_v38 = vpop.eup %627  ;;  %641 = vpow2.f32 %v220_v37 }
  0xdd   : > { %v630_v39 = vpop.eup %629  ;;  %v222_v42 = vmul.f32 1.442695, %v628_v38 }
  0xde   : > { %v224_v43 = vmul.f32 1.442695, %v630_v39 }
  0xdf   : > { %643 = vpow2.f32 %v222_v42 }
  0xe0   : > { %645 = vpow2.f32 %v224_v43  ;;  %v632_v45 = vpop.eup %631 }
  0xe1   : > { %v912_v46 = vpop.eup %633  ;;  %v239_v49 = vrot.slane %v632_v45, %v238_v44 }
  0xe2   : > { %v247_v51 = vrot.slane %v912_v46, %v238_v44 }
  0xe4   : > { %v636_v47 = vpop.eup %635 }
  0xe5   : > { %v914_v48 = vpop.eup %637  ;;  %v243_v50 = vrot.slane %v636_v47, %v238_v44 }
  0xe6   : > { %v251_v52 = vrot.slane %v914_v48, %v238_v44 }
  0xe7   : > { %v269_v53 = vsel %vm268_vm0, %v243_v50, %v239_v49 }
  0xe8   : > { %v919_v54 = vpop.eup %639  ;;  %v271_v55 = vsel %vm270_vm1, %v247_v51, %v269_v53 }
  0xe9   : > { %v922_v56 = vpop.eup %641  ;;  %v255_v57 = vrot.slane %v919_v54, %v238_v44  ;;  %v273_v58 = vsel %vm272_vm2, %v251_v52, %v271_v55 }
  0xea   : > { %v259_v59 = vrot.slane %v922_v56, %v238_v44 }
  0xeb   : > { %v275_v60 = vsel %vm274_vm3, %v255_v57, %v273_v58 }
  0xec   : > { %v928_v61 = vpop.eup %643  ;;  %v277_v3 = vsel %vm276_vm4, %v259_v59, %v275_v60 }
  0xed   : > { %v930_v62 = vpop.eup %645  ;;  %v263_v63 = vrot.slane %v928_v61, %v238_v44 }
  0xee   : > { %v267_v1 = vrot.slane %v930_v62, %v238_v44 }
  0xef   : > { %v279_v4 = vsel %vm278_vm5, %v263_v63, %v277_v3 }
  0xf0   : > { %v281_v7 = vsel %vm280_vm6, %v267_v1, %v279_v4 }
  0xf1   : > { %v284_v8 = vsel %vm283_vm7, %v281_v7, 0.0 }
  0xf2   : > { %285 = vadd.xlane.f32.xlu0 %v284_v8 }
 0x17b   : > { %v286_v17 = vpop.xlane.xlu0 %285 }
 0x17c   : > { %v295_v19 = vrot.slane %v286_v17, %v294_v12  ;;  %v291_v20 = vrot.slane %v286_v17, %v290_v15  ;;  %v299_v21 = vrot.slane %v286_v17, %v298_v16  ;;  %v303_v22 = vrot.slane %v286_v17, %v302_v18 }
 0x17d   : > { %v307_v24 = vrot.slane %v286_v17, %v306_v23  ;;  %v311_v26 = vrot.slane %v286_v17, %v310_v25  ;;  %v315_v29 = vrot.slane %v286_v17, %v314_v27  ;;  %v319_v38 = vrot.slane %v286_v17, %v318_v30 }
 0x17e   : > { %647 = vrcp.f32 %v295_v19 }
 0x17f   : > { %649 = vrcp.f32 %v291_v20 }
 0x180   : > { %651 = vrcp.f32 %v299_v21 }
 0x181   : > { %653 = vrcp.f32 %v303_v22 }
 0x182   : > { %655 = vrcp.f32 %v307_v24 }
 0x183   : > { %657 = vrcp.f32 %v311_v26 }
 0x184   : > { %659 = vrcp.f32 %v315_v29 }
 0x185   : > { %661 = vrcp.f32 %v319_v38 }
 0x18b   : > { %v648_v28 = vpop.eup %647 }
 0x18c   : > { %v650_v31 = vpop.eup %649  ;;  %v331_v32 = vmul.f32 %v648_v28, %v636_v47 }
 0x18d   : > { %v652_v33 = vpop.eup %651  ;;  %v329_v34 = vmul.f32 %v650_v31, %v632_v45 }
 0x18e   : > { %v345_v35 = vadd.f32 1e-10, %v331_v32  ;;  %v333_v37 = vmul.f32 %v652_v33, %v912_v46  ;;  %v654_v39 = vpop.eup %653 }
 0x18f   : > { %v344_v36 = vadd.f32 1e-10, %v329_v34  ;;  %v335_v42 = vmul.f32 %v654_v39, %v914_v48  ;;  %v656_v43 = vpop.eup %655 }
 0x190   : > { %359 = vperm.xlu0 %614, %v345_v35   ;;  %v346_v40 = vadd.f32 1e-10, %v333_v37  ;;  %v337_v44 = vmul.f32 %v656_v43, %v919_v54  ;;  %v658_v47 = vpop.eup %657 }
 0x191   : > { %354 = vperm.xlu1 %613, %v344_v36   ;;  %v347_v41 = vadd.f32 1e-10, %v335_v42  ;;  %v339_v49 = vmul.f32 %v658_v47, %v922_v56  ;;  %v660_v46 = vpop.eup %659 }
 0x192   : > { %v348_v45 = vadd.f32 1e-10, %v337_v44  ;;  %v341_v51 = vmul.f32 %v660_v46, %v928_v61  ;;  %v662_v52 = vpop.eup %661 }
 0x193   : > { %v349_v50 = vadd.f32 1e-10, %v339_v49  ;;  %v343_v48 = vmul.f32 %v662_v52, %v930_v62 }
 0x194   : > { %v350_v53 = vadd.f32 1e-10, %v341_v51 }
 0x195   : > { %364 = vperm.xlu1 %613, %v346_v40   ;;  %v351_v55 = vadd.f32 1e-10, %v343_v48 }
 0x199   : > { %369 = vperm.xlu1 %613, %v347_v41  }
 0x19d   : > { %374 = vperm.xlu1 %613, %v348_v45  }
 0x1a1   : > { %379 = vperm.xlu1 %613, %v349_v50  }
 0x1a5   : > { %384 = vperm.xlu1 %613, %v350_v53  }
 0x1a9   : > { %389 = vperm.xlu1 %613, %v351_v55  }
 0x20b   : > { %v360_v54 = vpop.permute.xlu0 %359 }
 0x20c   : > { %v355_v57 = vpop.permute.xlu1 %354  ;;  %v393_v58 = vmul.f32 %v360_v54, %v891_v5 }
 0x20d   : > { %v392_v56 = vmul.f32 %v355_v57, %v882_v0 }
 0x20e   : > { %v406_v63 = vrot.slane %v393_v58, 4 }
 0x20f   : > { %v400_v61 = vrot.slane %v392_v56, 4 }
 0x210   : > { %v365_v59 = vpop.permute.xlu1 %364  ;;  %v407_v62 = vadd.f32 %v406_v63, %v393_v58 }
 0x211   : > { %v394_v60 = vmul.f32 %v365_v59, %v887_v2  ;;  %v401_v11 = vadd.f32 %v400_v61, %v392_v56 }
 0x212   : > { %v408_v17 = vrot.slane %v407_v62, 2 }
 0x213   : > { %v412_v4 = vrot.slane %v394_v60, 4  ;;  %v402_v0 = vrot.slane %v401_v11, 2 }
 0x214   : > { %v370_v1 = vpop.permute.xlu1 %369 }
 0x215   : > { %v395_v3 = vmul.f32 %v370_v1, %v893_v6  ;;  %v413_v15 = vadd.f32 %v412_v4, %v394_v60  ;;  %v409_v6 = vadd.f32 %v408_v17, %v407_v62  ;;  %v403_v25 = vadd.f32 %v402_v0, %v401_v11 }
 0x217   : > { %v418_v7 = vrot.slane %v395_v3, 4  ;;  %v414_v20 = vrot.slane %v413_v15, 2  ;;  %v410_v31 = vrot.slane %v409_v6, 1  ;;  %v404_v34 = vrot.slane %v403_v25, 1 }
 0x218   : > { %v375_v8 = vpop.permute.xlu1 %374 }
 0x219   : > { %v396_v12 = vmul.f32 %v375_v8, %v897_v9  ;;  %v419_v16 = vadd.f32 %v418_v7, %v395_v3  ;;  %v415_v9 = vadd.f32 %v414_v20, %v413_v15  ;;  %v411_v42 = vadd.f32 %v410_v31, %v409_v6 }
 0x21b   : > { %v424_v5 = vrot.slane %v396_v12, 4  ;;  %v420_v21 = vrot.slane %v419_v16, 2  ;;  %v416_v37 = vrot.slane %v415_v9, 1 }
 0x21c   : > { %v380_v18 = vpop.permute.xlu1 %379 }
 0x21d   : > { %v425_v19 = vadd.f32 %v424_v5, %v396_v12  ;;  %v397_v2 = vmul.f32 %v380_v18, %v899_v10  ;;  %v421_v28 = vadd.f32 %v420_v21, %v419_v16  ;;  %v417_v45 = vadd.f32 %v416_v37, %v415_v9 }
 0x21f   : > { %v430_v22 = vrot.slane %v397_v2, 4  ;;  %v426_v23 = vrot.slane %v425_v19, 2  ;;  %v422_v38 = vrot.slane %v421_v28, 1 }
 0x220   : > { %v385_v24 = vpop.permute.xlu1 %384 }
 0x221   : > { %v431_v26 = vadd.f32 %v430_v22, %v397_v2  ;;  %v398_v27 = vmul.f32 %v385_v24, %v903_v13  ;;  %v427_v32 = vadd.f32 %v426_v23, %v425_v19  ;;  %v405_v13 = vadd.f32 %v404_v34, %v403_v25 }
 0x222   : > { %v423_v49 = vadd.f32 %v422_v38, %v421_v28 }
 0x223   : > { %v432_v29 = vrot.slane %v431_v26, 2  ;;  %v436_v30 = vrot.slane %v398_v27, 4  ;;  %v428_v43 = vrot.slane %v427_v32, 1  ;;  %v456_v52 = vsel %vm268_vm0, %v411_v42, %v405_v13 }
 0x224   : > { %v390_v33 = vpop.permute.xlu1 %389  ;;  %v457_v48 = vsel %vm270_vm1, %v417_v45, %v456_v52 }
 0x225   : > { %v433_v10 = vadd.f32 %v432_v29, %v431_v26  ;;  %v437_v35 = vadd.f32 %v436_v30, %v398_v27  ;;  %v399_v36 = vmul.f32 %v390_v33, %v905_v14  ;;  %v429_v51 = vadd.f32 %v428_v43, %v427_v32 }
 0x226   : > { %v458_v57 = vsel %vm272_vm2, %v423_v49, %v457_v48 }
 0x227   : > { %v438_v39 = vrot.slane %v437_v35, 2  ;;  %v442_v40 = vrot.slane %v399_v36, 4  ;;  %v434_v41 = vrot.slane %v433_v10, 1  ;;  %v459_v58 = vsel %vm274_vm3, %v429_v51, %v458_v57 }
 0x229   : > { %v439_v44 = vadd.f32 %v438_v39, %v437_v35  ;;  %v443_v47 = vadd.f32 %v442_v40, %v399_v36  ;;  %v435_v14 = vadd.f32 %v434_v41, %v433_v10 }
 0x22b   : > { %v440_v46 = vrot.slane %v439_v44, 1  ;;  %v444_v50 = vrot.slane %v443_v47, 2  ;;  %v460_v59 = vsel %vm276_vm4, %v435_v14, %v459_v58 }
 0x22d   : > { %v445_v53 = vadd.f32 %v444_v50, %v443_v47  ;;  %v441_v55 = vadd.f32 %v440_v46, %v439_v44 }
 0x22f   : > { %v446_v54 = vrot.slane %v445_v53, 1  ;;  %v461_v60 = vsel %vm278_vm5, %v441_v55, %v460_v59 }
 0x231   : > { %v447_v56 = vadd.f32 %v446_v54, %v445_v53 }
 0x233   : > { %v462_v63 = vsel %vm280_vm6, %v447_v56, %v461_v60 }
 0x234   : > { %464 = vst [vmem:[%s161_s4] sm:$0xff] %v462_v63 }
 0x235   : > { %704 = shalt.err (!%p701_p10)
}
 0x236   : > { %s705_s25 = scalar_lea.hbm %s970_s16, 128  ;;  %s709_s29 = scalar_lea.hbm %s1010_s2, 256 }
 0x237   : > { %p706_p0 = scmp.ne.s32.totalorder %s970_s16, %s705_s25  ;;  %p710_p1 = scmp.lt.s32.totalorder %s970_s16, %s1010_s2 }
 0x238   : > { %p711_p3 = scmp.lt.s32.totalorder %s709_s29, %s705_s25 }
 0x239   : > { %p707_p2 = pnand %p706_p0, %p1019_p12 }
 0x23a   : > { %p712_p6 = por %p711_p3, %p710_p1 }
 0x23b   : > { %p708_p9 = pneg %p707_p2 }
 0x23d   : > { %p713_p11 = pnand %p712_p6, %p708_p9 }
 0x23f   : > { %716 = shalt.err (!%p713_p11)
}
 0x240   : > { %566 = dma.vmem_to_hbm [thread:$0]  (%p1019_p12), %s480_s7, 128, %s970_s16, %s466_s17  }
 0x241 PF: > { %s491_s28 = sand.u32 1, %s743_s9   ;;  %p1020_p13 = scmp.ne.s32.totalorder %s1016_s22, 0 }
 0x242   : > { %p1021_p4 = scmp.ge.s32.totalorder %s755_s12, 2  ;;  %s492_s30 = scalar_lea.sflag [#allocation4], %s491_s28 }
 0x244   : > { %p573_p5 = pnand %p1021_p4, %p1020_p13 }
 0x246   : > { %p574_p7 = pneg %p573_p5 }
 0x248   : > { %738 = dma.done.wait (%p574_p7), %s492_s30, 128  }
 0x249   : > { %740 = vsyncadd (%p574_p7), %s492_s30, 4294967168  ;;  %p15_p8 = scmp.ge.s32.totalorder %s802_s15, 4   ;;  %s1022_s9 = smov %s747_s10 }
 0x24a   : > { %s1023_s10 = smov %s751_s11  ;;  %s1024_s11 = smov %s814_s18 }
 0x24b   : > { %s1025_s12 = smov %s802_s15  ;;  %17 = sbr.rel (!%p15_p8) target bundleno = 5 (0x5), region = 73 }
 0x250   :  { %497 = vsyncpa [#allocation3], 1 }
 0x251   :  { %499 = vsyncpa [#allocation3 + $0x1], 1 }
 0x252   :  { %500 = vsyncpa [#allocation4], 1 }
 0x253   :  { %502 = vsyncpa [#allocation4 + $0x1], 1 }

</bundles_post_ra>
